<compile_context>
chip_gen: v7x
topology: tpu7x:2x2x1
jax: 0.10.0
libtpu: 0.0.40
codegen_flags: <defaults>
</compile_context>

<pallas_src>
import math

import jax
import jax.numpy as jnp
from jax.experimental import pallas as pl
from jax.experimental.pallas import tpu as pltpu


# ----------------------------------------------------------------------------- utilities

def _round_up(n: int, m: int) -> int:
    return ((n + m - 1) // m) * m


def _cdiv(a: int, b: int) -> int:
    return (a + b - 1) // b


_VMEM_CAP = None


def _vmem_capacity() -> int:
    """Physical VMEM bytes of the local TPU (cached)."""
    global _VMEM_CAP
    if _VMEM_CAP is None:
        try:
            _VMEM_CAP = int(pltpu.get_tpu_info().vmem_capacity_bytes)
        except Exception:
            _VMEM_CAP = 64 << 20  # conservative: v7x per-TensorCore VMEM
    return _VMEM_CAP


_BUFFERED1_OK = None


def _weights_resident_kw() -> dict:
    """One-time capability probe: can this build single-buffer a constant-index block?"""
    global _BUFFERED1_OK
    if _BUFFERED1_OK is None:
        try:
            def _probe(x_ref, o_ref):
                o_ref[...] = x_ref[...]

            jax.block_until_ready(pl.pallas_call(
                _probe,
                out_shape=jax.ShapeDtypeStruct((8, 128), jnp.float32),
                grid_spec=pltpu.PrefetchScalarGridSpec(
                    num_scalar_prefetch=0,
                    grid=(2,),
                    in_specs=[pl.BlockSpec((8, 128), lambda i: (0, 0),
                                           pipeline_mode=pl.Buffered(1))],
                    out_specs=pl.BlockSpec((8, 128), lambda i: (0, 0)),
                ),
            )(jnp.zeros((8, 128), jnp.float32)))
            _BUFFERED1_OK = True
        except Exception:
            _BUFFERED1_OK = False
    return dict(pipeline_mode=pl.Buffered(1)) if _BUFFERED1_OK else {}


# ------------------------------------------------------------------------------- kernels

def _ffn_resident_kernel(x_ref, w1_ref, b1_ref, w2_ref, b2_ref, o_ref):
    # x: (tm, Cp)    w1: (Cp, Hp)    b1: (1, Hp) f32    w2: (Hp, Cp)    b2: (1, Cp) f32
    x = x_ref[...].astype(w1_ref.dtype)                       # cast on VPU, under MXU work
    h = jnp.dot(x, w1_ref[...], preferred_element_type=jnp.float32)
    h = jnp.maximum(h + b1_ref[...], 0.0)                      # bias + ReLU in f32
    y = jnp.dot(h.astype(w2_ref.dtype), w2_ref[...],
                preferred_element_type=jnp.float32)
    o_ref[...] = (y + b2_ref[...]).astype(o_ref.dtype)


def _ffn_htiled_kernel(x_ref, w1_ref, b1_ref, w2_ref, b2_ref, o_ref, acc_ref):
    # Hidden dim tiled on an "arbitrary" grid axis; exact because ReLU is elementwise in H.
    h_idx = pl.program_id(1)

    @pl.when(h_idx == 0)
    def _():
        acc_ref[...] = jnp.zeros_like(acc_ref)

    x = x_ref[...].astype(w1_ref.dtype)
    h = jnp.dot(x, w1_ref[...], preferred_element_type=jnp.float32)
    h = jnp.maximum(h + b1_ref[...], 0.0)
    acc_ref[...] += jnp.dot(h.astype(w2_ref.dtype), w2_ref[...],
                            preferred_element_type=jnp.float32)

    @pl.when(h_idx == pl.num_programs(1) - 1)
    def _():
        o_ref[...] = (acc_ref[...] + b2_ref[...]).astype(o_ref.dtype)


# ------------------------------------------------------------------------------- wrapper

def prepare_params(w1, b1, w2, b2, compute_dtype=jnp.bfloat16):
    """Pad weights/biases to lane multiples of 128 and cast ONCE (cache at param init)."""
    C, H = w1.shape
    assert w2.shape == (H, C) and b1.shape == (H,) and b2.shape == (C,)
    Cp, Hp = _round_up(C, 128), _round_up(H, 128)
    w1p = jnp.pad(jnp.asarray(w1, compute_dtype), ((0, Cp - C), (0, Hp - H)))
    w2p = jnp.pad(jnp.asarray(w2, compute_dtype), ((0, Hp - H), (0, Cp - C)))
    b1p = jnp.pad(jnp.asarray(b1, jnp.float32).reshape(1, H), ((0, 0), (0, Hp - H)))
    b2p = jnp.pad(jnp.asarray(b2, jnp.float32).reshape(1, C), ((0, 0), (0, Cp - C)))
    return dict(w1=w1p, b1=b1p, w2=w2p, b2=b2p, n_embed=C, hidden=H)


def feed_forward(x, params, *, row_tile=None, out_dtype=None, h_tile=None):
    """relu(x @ W1 + b1) @ W2 + b2 for x of shape (..., C), params from prepare_params()."""
    C = params["n_embed"]
    w1p, b1p, w2p, b2p = params["w1"], params["b1"], params["w2"], params["b2"]
    Cp, Hp = w1p.shape
    *lead, c_in = x.shape
    assert c_in == C, f"expected last dim {C}, got {c_in}"
    M = math.prod(lead) if lead else 1

    out_dtype = x.dtype if out_dtype is None else jnp.dtype(out_dtype)
    w_is = jnp.dtype(w1p.dtype).itemsize
    x_is = jnp.dtype(x.dtype).itemsize
    o_is = jnp.dtype(out_dtype).itemsize

    vmem_cap = _vmem_capacity()
    budget = int(vmem_cap * 0.85)                 # headroom below physical per-TC VMEM
    if row_tile is None:
        row_tile = 512 if vmem_cap >= (96 << 20) else 256   # v5e/v6e vs v7x default

    # Balanced row tiles: minimize zero-row padding; give TC#1 work when M allows.
    sub = 16 if min(x_is, o_is, w_is) < 4 else 8
    nt = max(1, _cdiv(M, row_tile))
    if nt == 1 and M >= 2 * sub:
        nt = 2
    tm = _round_up(_cdiv(M, nt), sub)
    nt = _cdiv(M, tm)
    Mp = nt * tm

    resident_kw = _weights_resident_kw()
    nbuf = 1 if resident_kw else 2

    def _resident_est():
        return (2 * tm * Cp * (x_is + o_is)                     # x/out tiles (dbl-buffered)
                + nbuf * (2 * Cp * Hp * w_is + (Hp + Cp) * 4)   # resident W1,W2,b1,b2
                + tm * Hp * (4 + w_is)                          # hidden acts (f32 + cast)
                + tm * Cp * 4)                                  # f32 result before cast

    def _htiled_est(th):
        return (2 * tm * Cp * (x_is + o_is)
                + 2 * 2 * Cp * th * w_is + 2 * th * 4           # W1/W2/b1 slabs (dbl-buf)
                + nbuf * Cp * 4                                 # resident b2
                + tm * th * (4 + w_is)                          # hidden slab
                + tm * Cp * 4)                                  # accumulator scratch

    # Path selection: weights resident if they fit the per-core budget, else H-tiled.
    if h_tile is not None and 0 < h_tile < Hp and Hp % h_tile == 0:
        th = int(h_tile)
    elif _resident_est() <= budget:
        th = None
    else:
        th = next((t for t in (1024, 512, 256, 128)
                   if Hp % t == 0 and _htiled_est(t) <= budget), 128)

    vmem_est = _resident_est() if th is None else _htiled_est(th)
    vmem_limit = int(min(budget, max(vmem_est * 3 // 2 + (4 << 20), 16 << 20)))

    # Only pad when actually ragged (avoids an extra HBM round trip on aligned shapes).
    x2d = x.reshape(M, C)
    if Mp != M or Cp != C:
        x2d = jnp.pad(x2d, ((0, Mp - M), (0, Cp - C)))

    flops = 4 * Mp * Cp * Hp
    bytes_accessed = (Mp * Cp * (x_is + o_is) + 2 * Cp * Hp * w_is + (Hp + Cp) * 4)
    cost = pl.CostEstimate(flops=int(flops), transcendentals=0,
                           bytes_accessed=int(bytes_accessed))

    if th is None:
        out2d = pl.pallas_call(
            _ffn_resident_kernel,
            out_shape=jax.ShapeDtypeStruct((Mp, Cp), out_dtype),
            grid_spec=pltpu.PrefetchScalarGridSpec(
                num_scalar_prefetch=0,
                grid=(Mp // tm,),
                in_specs=[
                    pl.BlockSpec((tm, Cp), lambda i: (i, 0)),             # x row tile
                    pl.BlockSpec((Cp, Hp), lambda i: (0, 0), **resident_kw),  # W1 resident
                    pl.BlockSpec((1, Hp), lambda i: (0, 0), **resident_kw),   # b1 resident
                    pl.BlockSpec((Hp, Cp), lambda i: (0, 0), **resident_kw),  # W2 resident
                    pl.BlockSpec((1, Cp), lambda i: (0, 0), **resident_kw),   # b2 resident
                ],
                out_specs=pl.BlockSpec((tm, Cp), lambda i: (i, 0)),
            ),
            compiler_params=pltpu.CompilerParams(
                dimension_semantics=("parallel",),
                vmem_limit_bytes=vmem_limit),
            cost_estimate=cost,
        )(x2d, w1p, b1p, w2p, b2p)
    else:
        out2d = pl.pallas_call(
            _ffn_htiled_kernel,
            out_shape=jax.ShapeDtypeStruct((Mp, Cp), out_dtype),
            grid_spec=pltpu.PrefetchScalarGridSpec(
                num_scalar_prefetch=0,
                grid=(Mp // tm, Hp // th),
                in_specs=[
                    pl.BlockSpec((tm, Cp), lambda i, h: (i, 0)),          # x row tile
                    pl.BlockSpec((Cp, th), lambda i, h: (0, h)),          # W1 column slab
                    pl.BlockSpec((1, th), lambda i, h: (0, h)),           # b1 slab
                    pl.BlockSpec((th, Cp), lambda i, h: (h, 0)),          # W2 row slab
                    pl.BlockSpec((1, Cp), lambda i, h: (0, 0), **resident_kw),  # b2 resident
                ],
                out_specs=pl.BlockSpec((tm, Cp), lambda i, h: (i, 0)),
                scratch_shapes=[pltpu.VMEM((tm, Cp), jnp.float32)],       # f32 accumulator
            ),
            compiler_params=pltpu.CompilerParams(
                dimension_semantics=("parallel", "arbitrary"),
                vmem_limit_bytes=vmem_limit),
            cost_estimate=cost,
        )(x2d, w1p, b1p, w2p, b2p)

    if Mp != M or Cp != C:
        out2d = out2d[:M, :C]
    return out2d.reshape(*lead, C)


# ---------------------------------------------------------------------------------- test

if __name__ == "__main__":
    # Small shapes consistent with the module: batch=2, seq=8, n_embed=32 (hidden=128).
    B, T, C = 2, 8, 32
    H = 4 * C

    key = jax.random.PRNGKey(0)
    kx, kw1, kb1, kw2, kb2, key2 = jax.random.split(key, 6)

    x = jax.random.normal(kx, (B, T, C), dtype=jnp.float32)
    # PyTorch nn.Linear default-like uniform init bounds.
    bound1 = 1.0 / (C ** 0.5)
    bound2 = 1.0 / (H ** 0.5)
    w1 = jax.random.uniform(kw1, (C, H), minval=-bound1, maxval=bound1, dtype=jnp.float32)
    b1 = jax.random.uniform(kb1, (H,), minval=-bound1, maxval=bound1, dtype=jnp.float32)
    w2 = jax.random.uniform(kw2, (H, C), minval=-bound2, maxval=bound2, dtype=jnp.float32)
    b2 = jax.random.uniform(kb2, (C,), minval=-bound2, maxval=bound2, dtype=jnp.float32)

    ref = (jnp.maximum(x.reshape(-1, C) @ w1 + b1, 0.0) @ w2 + b2).reshape(B, T, C)

    # Default fast path: resident bf16 weights (prepared once), f32 accumulation.
    params_bf16 = prepare_params(w1, b1, w2, b2)                 # done once, reused per call
    out = jax.block_until_ready(feed_forward(x, params_bf16))
    assert out.shape == (B, T, C)
    assert jnp.allclose(out, ref, atol=2e-2, rtol=2e-2), float(jnp.max(jnp.abs(out - ref)))

    # bf16 output variant (halves output DMA) — looser tolerance for the output cast.
    out_bf16 = jax.block_until_ready(feed_forward(x, params_bf16, out_dtype=jnp.bfloat16))
    assert out_bf16.dtype == jnp.bfloat16
    assert jnp.allclose(out_bf16.astype(jnp.float32), ref, atol=6e-2, rtol=6e-2), \
        float(jnp.max(jnp.abs(out_bf16.astype(jnp.float32) - ref)))

    # Full-f32 path (tighter numerics check of the same tiling / padding machinery).
    params_f32 = prepare_params(w1, b1, w2, b2, compute_dtype=jnp.float32)
    out_f32 = jax.block_until_ready(feed_forward(x, params_f32))
    assert jnp.allclose(out_f32, ref, atol=1e-3, rtol=1e-3), \
        float(jnp.max(jnp.abs(out_f32 - ref)))

    # Ragged shapes (B*T, C, H not multiples of the tiles) exercise the padding path.
    B2, T2, C2 = 2, 5, 40
    H2 = 4 * C2
    kx2, kw12, kb12, kw22, kb22 = jax.random.split(key2, 5)
    x2 = jax.random.normal(kx2, (B2, T2, C2), dtype=jnp.float32)
    s1, s2 = 1.0 / (C2 ** 0.5), 1.0 / (H2 ** 0.5)
    w12 = jax.random.uniform(kw12, (C2, H2), minval=-s1, maxval=s1, dtype=jnp.float32)
    b12 = jax.random.uniform(kb12, (H2,), minval=-s1, maxval=s1, dtype=jnp.float32)
    w22 = jax.random.uniform(kw22, (H2, C2), minval=-s2, maxval=s2, dtype=jnp.float32)
    b22 = jax.random.uniform(kb22, (C2,), minval=-s2, maxval=s2, dtype=jnp.float32)
    params2 = prepare_params(w12, b12, w22, b22)
    ref2 = (jnp.maximum(x2.reshape(-1, C2) @ w12 + b12, 0.0) @ w22 + b22).reshape(B2, T2, C2)

    out2 = jax.block_until_ready(feed_forward(x2, params2))
    assert jnp.allclose(out2, ref2, atol=2e-2, rtol=2e-2), \
        float(jnp.max(jnp.abs(out2 - ref2)))

    # Force the H-tiled accumulator path (the big-weight / v7x fallback) and re-check.
    out2_ht = jax.block_until_ready(feed_forward(x2, params2, h_tile=128))
    assert jnp.allclose(out2_ht, ref2, atol=2e-2, rtol=2e-2), \
        float(jnp.max(jnp.abs(out2_ht - ref2)))

    print("KERNEL_OK")
</pallas_src>

<mosaic_0001>
module attributes {stable_mosaic.version = 11 : i64} {
  func.func @_probe(%arg0: i32, %arg1: memref<8x128xf32, #tpu.memory_space<vmem>>, %arg2: memref<8x128xf32, #tpu.memory_space<vmem>>) attributes {dimension_semantics = [#tpu.dimension_semantics<arbitrary>], iteration_bounds = array<i64: 2>, scalar_prefetch = 0 : i64, scratch_operands = 0 : i64, tpu.core_type = #tpu.core_type<tc>, window_params = [{pipeline_mode = #tpu.pipeline_mode<synchronous>, transform_indices = @transform_0, window_bounds = array<i64: 8, 128>}, {pipeline_mode = #tpu.pipeline_mode<synchronous>, transform_indices = @transform_1, window_bounds = array<i64: 8, 128>}]} {
    %c0 = arith.constant 0 : index
    %c0_0 = arith.constant 0 : index
    %0 = vector.load %arg1[%c0, %c0_0] : memref<8x128xf32, #tpu.memory_space<vmem>>, vector<8x128xf32>
    %c0_1 = arith.constant 0 : index
    %c0_2 = arith.constant 0 : index
    %1 = vector.load %arg2[%c0_1, %c0_2] : memref<8x128xf32, #tpu.memory_space<vmem>>, vector<8x128xf32>
    tpu.vector_store %arg2[%c0_1, %c0_2], %0 {strides = array<i32>} : memref<8x128xf32, #tpu.memory_space<vmem>>, vector<8x128xf32>,
    return
  }
  func.func @transform_0(%arg0: i32) -> (i32, i32) {
    %c0_i32 = arith.constant 0 : i32
    %c0_i32_0 = arith.constant 0 : i32
    %c0_i32_1 = arith.constant 0 : i32
    return %c0_i32, %c0_i32_0 : i32, i32
  }
  func.func @transform_1(%arg0: i32) -> (i32, i32) {
    %c0_i32 = arith.constant 0 : i32
    %c0_i32_0 = arith.constant 0 : i32
    %c0_i32_1 = arith.constant 0 : i32
    return %c0_i32, %c0_i32_0 : i32, i32
  }
}

module attributes {stable_mosaic.version = 11 : i64} {
  func.func @_ffn_resident_kernel(%arg0: i32, %arg1: memref<16x128xf32, #tpu.memory_space<vmem>>, %arg2: memref<128x128xbf16, #tpu.memory_space<vmem>>, %arg3: memref<1x128xf32, #tpu.memory_space<vmem>>, %arg4: memref<128x128xbf16, #tpu.memory_space<vmem>>, %arg5: memref<1x128xf32, #tpu.memory_space<vmem>>, %arg6: memref<16x128xf32, #tpu.memory_space<vmem>>) attributes {dimension_semantics = [#tpu.dimension_semantics<parallel>], iteration_bounds = array<i64: 1>, scalar_prefetch = 0 : i64, scratch_operands = 0 : i64, tpu.core_type = #tpu.core_type<tc>, window_params = [{transform_indices = @transform_0, window_bounds = array<i64: 16, 128>}, {pipeline_mode = #tpu.pipeline_mode<synchronous>, transform_indices = @transform_1, window_bounds = array<i64: 128, 128>}, {pipeline_mode = #tpu.pipeline_mode<synchronous>, transform_indices = @transform_2, window_bounds = array<i64: 1, 128>}, {pipeline_mode = #tpu.pipeline_mode<synchronous>, transform_indices = @transform_3, window_bounds = array<i64: 128, 128>}, {pipeline_mode = #tpu.pipeline_mode<synchronous>, transform_indices = @transform_4, window_bounds = array<i64: 1, 128>}, {transform_indices = @transform_5, window_bounds = array<i64: 16, 128>}]} {
    %c0 = arith.constant 0 : index
    %c0_0 = arith.constant 0 : index
    %0 = vector.load %arg1[%c0, %c0_0] : memref<16x128xf32, #tpu.memory_space<vmem>>, vector<16x128xf32>
    %1 = arith.truncf %0 : vector<16x128xf32> to vector<16x128xbf16>
    %c0_1 = arith.constant 0 : index
    %c0_2 = arith.constant 0 : index
    %2 = vector.load %arg2[%c0_1, %c0_2] : memref<128x128xbf16, #tpu.memory_space<vmem>>, vector<128x128xbf16>
    %cst = arith.constant dense<0.000000e+00> : vector<16x128xf32>
    %3 = tpu.matmul %1, %2, %cst {dimension_numbers = #tpu.dot_dimension_numbers<[1], [0], [0], [1], [0, 0, 1, 1], [], []>} : vector<16x128xbf16>, vector<128x128xbf16>, vector<16x128xf32> -> vector<16x128xf32>
    %c0_3 = arith.constant 0 : index
    %c0_4 = arith.constant 0 : index
    %4 = vector.load %arg3[%c0_3, %c0_4] : memref<1x128xf32, #tpu.memory_space<vmem>>, vector<1x128xf32>
    %5 = vector.broadcast %4 : vector<1x128xf32> to vector<16x128xf32>
    %6 = arith.addf %3, %5 : vector<16x128xf32>
    %cst_5 = arith.constant 0.000000e+00 : f32
    %7 = vector.broadcast %cst_5 : f32 to vector<16x128xf32>
    %8 = arith.maximumf %6, %7 : vector<16x128xf32>
    %9 = arith.truncf %8 : vector<16x128xf32> to vector<16x128xbf16>
    %c0_6 = arith.constant 0 : index
    %c0_7 = arith.constant 0 : index
    %10 = vector.load %arg4[%c0_6, %c0_7] : memref<128x128xbf16, #tpu.memory_space<vmem>>, vector<128x128xbf16>
    %cst_8 = arith.constant dense<0.000000e+00> : vector<16x128xf32>
    %11 = tpu.matmul %9, %10, %cst_8 {dimension_numbers = #tpu.dot_dimension_numbers<[1], [0], [0], [1], [0, 0, 1, 1], [], []>} : vector<16x128xbf16>, vector<128x128xbf16>, vector<16x128xf32> -> vector<16x128xf32>
    %c0_9 = arith.constant 0 : index
    %c0_10 = arith.constant 0 : index
    %12 = vector.load %arg5[%c0_9, %c0_10] : memref<1x128xf32, #tpu.memory_space<vmem>>, vector<1x128xf32>
    %13 = vector.broadcast %12 : vector<1x128xf32> to vector<16x128xf32>
    %14 = arith.addf %11, %13 : vector<16x128xf32>
    %c0_11 = arith.constant 0 : index
    %c0_12 = arith.constant 0 : index
    %15 = vector.load %arg6[%c0_11, %c0_12] : memref<16x128xf32, #tpu.memory_space<vmem>>, vector<16x128xf32>
    tpu.vector_store %arg6[%c0_11, %c0_12], %14 {strides = array<i32>} : memref<16x128xf32, #tpu.memory_space<vmem>>, vector<16x128xf32>,
    return
  }
  func.func @transform_0(%arg0: i32) -> (i32, i32) {
    %c0_i32 = arith.constant 0 : i32
    %c0_i32_0 = arith.constant 0 : i32
    return %arg0, %c0_i32 : i32, i32
  }
  func.func @transform_1(%arg0: i32) -> (i32, i32) {
    %c0_i32 = arith.constant 0 : i32
    %c0_i32_0 = arith.constant 0 : i32
    %c0_i32_1 = arith.constant 0 : i32
    return %c0_i32, %c0_i32_0 : i32, i32
  }
  func.func @transform_2(%arg0: i32) -> (i32, i32) {
    %c0_i32 = arith.constant 0 : i32
    %c0_i32_0 = arith.constant 0 : i32
    %c0_i32_1 = arith.constant 0 : i32
    return %c0_i32, %c0_i32_0 : i32, i32
  }
  func.func @transform_3(%arg0: i32) -> (i32, i32) {
    %c0_i32 = arith.constant 0 : i32
    %c0_i32_0 = arith.constant 0 : i32
    %c0_i32_1 = arith.constant 0 : i32
    return %c0_i32, %c0_i32_0 : i32, i32
  }
  func.func @transform_4(%arg0: i32) -> (i32, i32) {
    %c0_i32 = arith.constant 0 : i32
    %c0_i32_0 = arith.constant 0 : i32
    %c0_i32_1 = arith.constant 0 : i32
    return %c0_i32, %c0_i32_0 : i32, i32
  }
  func.func @transform_5(%arg0: i32) -> (i32, i32) {
    %c0_i32 = arith.constant 0 : i32
    %c0_i32_0 = arith.constant 0 : i32
    return %arg0, %c0_i32 : i32, i32
  }
}

</mosaic_0001>

<bundles_post_ra>
// kernel: tpu_custom_call.1
= control target key start
LH: loop header
LB: loop body
LE: loop exit
PB: predicated region body
PF: predicated region fallthrough
CT: control target
= control target key end

     0   :  { %6 = vsyncpa [#allocation3], 0  ;;  %s340_s0 = inlined_call_operand.hbm [shape: f32[8,128], index: 0, kind: input, shape index: {}]   ;;  %s341_s1 = inlined_call_operand.hbm [shape: f32[8,128], index: 1, kind: output, shape index: {}]  }
   0x1   :  { %7 = vsyncpa [#allocation4], 0  ;;  %s261_s6 = smov 0  }
   0x2 LB: > { %s144_s7 = sadd.s32 4294967295, %s247_s6   ;;  %p145_p0 = scmp.ge.s32.totalorder %s247_s6, 1  ;;  %s247_s6 = sphi %s261_s6, %s13_s6  }
   0x3   : > { %p60_p1 = scmp.lt.s32.totalorder %s247_s6, 3  ;;  %p275_p3 = scmp.eq.s32.totalorder %s144_s7, 0 }
   0x4   : > { %s249_s10 = smov [#allocation2]   ;;  %s179_s15 = scalar_lea.hbm %s340_s0, 128 }
   0x5   : > { %p269_p2 = pnand %p145_p0, %p60_p1  ;;  %s73_s11 = sshll.u32 %s249_s10, 4  ;;  %s74_s11 = int_to_ptr.vmem [resolvable:$true] %s73_s11 }
   0x6   : > { %s346_s9 = scalar_select %p275_p3, 1, 0 }
   0x7   : > { %s345_s8 = scalar_select %p269_p2, 1, 0 }
   0x8   : > { %p161_p4 = pneg %p269_p2  ;;  %p180_p6 = scmp.ne.s32.totalorder %s340_s0, %s179_s15 }
   0x9   : > { %p186_p10 = scmp.lt.u32.totalorder %s179_s15, %s340_s0 }
   0xa   : > { %p283_p5 = pnand %p275_p3, %p161_p4 }
   0xc   : > { %p181_p7 = pneg %p283_p5 }
   0xe   : > { %p182_p8 = pnand %p181_p7, %p180_p6 }
  0x10   : > { %p183_p9 = pneg %p182_p8 }
  0x12   : > { %p188_p11 = pnand %p186_p10, %p183_p9 }
  0x14   : > { %191 = shalt.err (!%p188_p11)
}
  0x15   : > { %s192_s20 = scalar_lea.vmem %s74_s11, 128  ;;  %p200_p1 = scmp.lt.s32.totalorder %s74_s11, %s74_s11 }
  0x16   : > { %p193_p12 = scmp.ne.s32.totalorder %s74_s11, %s192_s20  ;;  %p201_p4 = scmp.lt.s32.totalorder %s192_s20, %s192_s20 }
  0x18   : > { %p195_p13 = pnand %p193_p12, %p181_p7  ;;  %p202_p3 = por %p201_p4, %p200_p1 }
  0x1a   : > { %p196_p0 = pneg %p195_p13 }
  0x1c   : > { %p203_p2 = pnand %p202_p3, %p196_p0 }
  0x1e   : > { %206 = shalt.err (!%p203_p2)
}
  0x1f   : > { %164 = dma.hbm_to_vmem [thread:$0]  (!%p283_p5), %s340_s0, 128, %s74_s11, [#allocation3]  }
  0x20   : > { %p348_p6 = scmp.ne.s32.totalorder %s345_s8, 0 }
  0x21   : > { %p349_p8 = scmp.ne.s32.totalorder (!%p348_p6), %s346_s9, 0 }
  0x22   : > { %86 = sbr.rel (%p348_p6) target bundleno = 67 (0x43), region = 24 }
  0x29   : > { %238 = dma.done.wait (%p349_p8), [#allocation3], 128  }
  0x2a   : > { %240 = vsyncadd (%p349_p8), [#allocation3], 4294967168  ;;  %s250_s23 = smov [#allocation5]   ;;  %p311_p2 = scmp.eq.s32.totalorder %s144_s7, 1  ;;  %v96_v0 = vld [vmem:[#allocation2] sm:$0xff] }
  0x2b   : > { %s105_s24 = sshll.u32 %s250_s23, 4  ;;  %97 = vst [vmem:[#allocation5] sm:$0xff] %v96_v0  ;;  %s106_s24 = int_to_ptr.vmem [resolvable:$true] %s105_s24 }
  0x2c   : > { %s207_s26 = scalar_lea.vmem %s106_s24, 128  ;;  %p214_p9 = scmp.lt.s32.totalorder %s106_s24, %s106_s24 }
  0x2d   : > { %p208_p3 = scmp.ne.s32.totalorder %s106_s24, %s207_s26  ;;  %p215_p10 = scmp.lt.s32.totalorder %s207_s26, %s207_s26 }
  0x2f   : > { %p209_p5 = pnand %p208_p3, %p311_p2  ;;  %p216_p11 = por %p215_p10, %p214_p9 }
  0x31   : > { %p210_p7 = pneg %p209_p5 }
  0x33   : > { %p217_p12 = pnand %p216_p11, %p210_p7 }
  0x35   : > { %220 = shalt.err (!%p217_p12)
}
  0x36   : > { %s221_s29 = scalar_lea.hbm %s341_s1, 128 }
  0x37   : > { %p222_p13 = scmp.ne.s32.totalorder %s341_s1, %s221_s29  ;;  %p227_p4 = scmp.lt.u32.totalorder %s221_s29, %s341_s1 }
  0x39   : > { %p223_p0 = pnand %p222_p13, %p311_p2 }
  0x3b   : > { %p224_p1 = pneg %p223_p0 }
  0x3d   : > { %p229_p6 = pnand %p227_p4, %p224_p1 }
  0x3f   : > { %232 = shalt.err (!%p229_p6)
}
  0x40   : > { %158 = dma.vmem_to_hbm [thread:$0]  (%p311_p2), %s106_s24, 128, %s341_s1, [#allocation4]  }
  0x41   : > { %242 = dma.done.wait (%p311_p2), [#allocation4], 128  }
  0x42   : > { %244 = vsyncadd (%p311_p2), [#allocation4], 4294967168 }
  0x43 PF: > { %s13_s6 = sadd.s32 1, %s247_s6  }
  0x44   : > { %p10_p8 = scmp.ge.s32.totalorder %s13_s6, 4  }
  0x46   :  { %12 = sbr.rel (!%p10_p8) target bundleno = 2 (0x2), region = 53 }
  0x4d   :  { %118 = vsyncpa [#allocation3], 1 }
  0x4e   :  { %120 = vsyncpa [#allocation3 + $0x1], 1 }
  0x4f   :  { %121 = vsyncpa [#allocation4], 1 }
  0x50   :  { %123 = vsyncpa [#allocation4 + $0x1], 1 }

// kernel: tpu_custom_call.1
= control target key start
LH: loop header
LB: loop body
LE: loop exit
PB: predicated region body
PF: predicated region fallthrough
CT: control target
= control target key end

     0   :  { %10 = vsyncpa [#allocation3], 0  ;;  %s615_s0 = inlined_call_operand.hbm [shape: f32[16,128], index: 0, kind: input, shape index: {}]   ;;  %s616_s1 = inlined_call_operand.hbm [shape: bf16[128,128], index: 1, kind: input, shape index: {}]   ;;  %s617_s2 = inlined_call_operand.vmem [shape: f32[1,128], index: 2, kind: input, shape index: {}]   ;;  %s618_s3 = inlined_call_operand.hbm [shape: bf16[128,128], index: 3, kind: input, shape index: {}]   ;;  %s619_s4 = inlined_call_operand.vmem [shape: f32[1,128], index: 4, kind: input, shape index: {}]   ;;  %s620_s5 = inlined_call_operand.hbm [shape: f32[16,128], index: 5, kind: output, shape index: {}]  }
   0x1   :  { %11 = vsyncpa [#allocation6], 0 }
   0x2   :  { %12 = vsyncpa [#allocation4], 0  ;;  %s509_s18 = smov [#allocation5]   ;;  %s415_s22 = scalar_lea.hbm %s616_s1, 1024 }
   0x3   :  { %s30_s19 = sshll.u32 %s509_s18, 4  ;;  %p416_p0 = scmp.ne.s32.totalorder %s616_s1, %s415_s22  ;;  %s31_s19 = int_to_ptr.vmem [resolvable:$true] %s30_s19 }
   0x4   :  { %p419_p1 = scmp.lt.u32.totalorder %s415_s22, %s616_s1 }
   0x6   :  { %p421_p2 = pnand %p419_p1, %p416_p0 }
   0x8   :  { %424 = shalt.err (!%p421_p2)
}
   0x9   :  { %s425_s27 = scalar_lea.vmem %s31_s19, 1024  ;;  %p430_p4 = scmp.lt.s32.totalorder %s31_s19, %s31_s19 }
   0xa   :  { %p426_p3 = scmp.ne.s32.totalorder %s31_s19, %s425_s27  ;;  %p431_p5 = scmp.lt.s32.totalorder %s425_s27, %s425_s27 }
   0xc   :  { %p432_p6 = por %p431_p5, %p430_p4 }
   0xe   :  { %p433_p7 = pnand %p432_p6, %p426_p3 }
  0x10   :  { %436 = shalt.err (!%p433_p7)
}
  0x11   :  { %s510_s28 = smov 64   ;;  %s511_s29 = smov 4  }
  0x12   :  { %36 = dma.hbm_to_vmem [thread:$0]  %s616_s1, 1024, %s31_s19, [#allocation6], %s510_s28, %s510_s28, %s511_s29  }
  0x13   :  { %s512_s7 = smov [#allocation2]   ;;  %s437_s11 = scalar_lea.hbm %s615_s0, 256 }
  0x14   :  { %s18_s8 = sshll.u32 %s512_s7, 4  ;;  %p438_p8 = scmp.ne.s32.totalorder %s615_s0, %s437_s11  ;;  %s19_s8 = int_to_ptr.vmem [resolvable:$true] %s18_s8 }
  0x15   :  { %p441_p9 = scmp.lt.u32.totalorder %s437_s11, %s615_s0 }
  0x17   :  { %p443_p10 = pnand %p441_p9, %p438_p8 }
  0x19   :  { %446 = shalt.err (!%p443_p10)
}
  0x1a   :  { %s447_s16 = scalar_lea.vmem %s19_s8, 256  ;;  %p452_p12 = scmp.lt.s32.totalorder %s19_s8, %s19_s8 }
  0x1b   :  { %p448_p11 = scmp.ne.s32.totalorder %s19_s8, %s447_s16  ;;  %p453_p13 = scmp.lt.s32.totalorder %s447_s16, %s447_s16 }
  0x1d   :  { %p454_p0 = por %p453_p13, %p452_p12 }
  0x1f   :  { %p455_p1 = pnand %p454_p0, %p448_p11 }
  0x21   :  { %458 = shalt.err (!%p455_p1)
}
  0x22   :  { %s513_s1 = smov 128   ;;  %s514_s17 = smov 8  }
  0x23   :  { %24 = dma.hbm_to_vmem [thread:$0]  %s615_s0, 256, %s19_s8, [#allocation3], %s513_s1, %s513_s1, %s514_s17  }
  0x24   :  { %s515_s20 = smov [#allocation7]   ;;  %s459_s24 = scalar_lea.hbm %s618_s3, 1024 }
  0x25   :  { %s44_s21 = sshll.u32 %s515_s20, 4  ;;  %p460_p2 = scmp.ne.s32.totalorder %s618_s3, %s459_s24  ;;  %s45_s21 = int_to_ptr.vmem [resolvable:$true] %s44_s21 }
  0x26   :  { %p463_p3 = scmp.lt.u32.totalorder %s459_s24, %s618_s3 }
  0x28   :  { %p465_p4 = pnand %p463_p3, %p460_p2 }
  0x2a   :  { %468 = shalt.err (!%p465_p4)
}
  0x2b   :  { %s469_s6 = scalar_lea.vmem %s45_s21, 1024  ;;  %p474_p6 = scmp.lt.s32.totalorder %s45_s21, %s45_s21 }
  0x2c   :  { %p470_p5 = scmp.ne.s32.totalorder %s45_s21, %s469_s6  ;;  %p475_p7 = scmp.lt.s32.totalorder %s469_s6, %s469_s6 }
  0x2e   :  { %p476_p8 = por %p475_p7, %p474_p6 }
  0x30   :  { %p477_p9 = pnand %p476_p8, %p470_p5 }
  0x32   :  { %480 = shalt.err (!%p477_p9)
}
  0x33   :  { %50 = dma.hbm_to_vmem [thread:$0]  %s618_s3, 1024, %s45_s21, [#allocation6], %s510_s28, %s510_s28, %s511_s29  }
  0x34   :  { %503 = dma.done.wait [#allocation3], 256  }
  0x35   :  { %504 = vsyncadd [#allocation3], 4294967040 }
  0x36   :  { %505 = dma.done.wait [#allocation6], 2048  }
  0x37   :  { %506 = vsyncadd [#allocation6], 4294965248  ;;  %v516_v0 = vmov 0.0   ;;  %vm517_vm0 = vmmov 0   ;;  %v399_v1 = vld [vmem:[#allocation5] sm:$0xff]   ;;  %v400_v2 = vld [vmem:[#allocation5 + $0x8] sm:$0xff]  }
  0x38   :  { %349 = vmatprep.subr.bf16.mxu0 %v516_v0  ;;  %365 = vmatprep.mubr.msk.bf16.mxu0 %vm517_vm0, %v516_v0  ;;  %v401_v3 = vld [vmem:[#allocation5 + $0x10] sm:$0xff]   ;;  %v407_v4 = vld [vmem:[#allocation7] sm:$0xff]   ;;  %v402_v5 = vld [vmem:[#allocation5 + $0x18] sm:$0xff]   ;;  %s518_s9 = smov [#allocation8]  }
  0x39   :  { %369 = vmatprep.subr.bf16.mxu1 %v516_v0  ;;  %385 = vmatprep.mubr.msk.bf16.mxu1 %vm517_vm0, %v516_v0  ;;  %v408_v6 = vld [vmem:[#allocation7 + $0x8] sm:$0xff]   ;;  %v403_v7 = vld [vmem:[#allocation5 + $0x20] sm:$0xff]   ;;  %v409_v8 = vld [vmem:[#allocation7 + $0x10] sm:$0xff]   ;;  %s300_s10 = sshll.u32 %s518_s9, 4  ;;  %s301_s10 = int_to_ptr.vmem [resolvable:$true] %s300_s10 }
  0x3a   :  { %350 = vmatpush3.bf16.msra.mxu0 %v399_v1  ;;  %370 = vmatpush3.bf16.msra.mxu1 %v407_v4  ;;  %v404_v9 = vld [vmem:[#allocation5 + $0x28] sm:$0xff]   ;;  %v410_v10 = vld [vmem:[#allocation7 + $0x18] sm:$0xff]   ;;  %v405_v11 = vld [vmem:[#allocation5 + $0x30] sm:$0xff]   ;;  %p486_p11 = scmp.lt.s32.totalorder %s301_s10, %s301_s10 }
  0x3b   :  { %351 = vmatprep.subr.bf16.mxu0 %v516_v0  ;;  %371 = vmatprep.subr.bf16.mxu1 %v516_v0  ;;  %v411_v12 = vld [vmem:[#allocation7 + $0x20] sm:$0xff]   ;;  %v406_v13 = vld [vmem:[#allocation5 + $0x38] sm:$0xff]   ;;  %v63_v14 = vld [vmem:[#allocation2] sm:$0xff] }
  0x3c   :  { %v64_v15 = vld [vmem:[#allocation2 + $0x8] sm:$0xff]  ;;  %v412_v16 = vld [vmem:[#allocation7 + $0x28] sm:$0xff]   ;;  %v413_v18 = vld [vmem:[#allocation7 + $0x30] sm:$0xff]  }
  0x3d   :  { %v65_v17 = vpack.c.bf16 %v64_v15, %v63_v14  ;;  %v414_v19 = vld [vmem:[#allocation7 + $0x38] sm:$0xff]   ;;  %v313_v20 = vld [vmem:[%s617_s2] ss:$0 sm:$0xff]  ;;  %s481_s2 = scalar_lea.vmem %s301_s10, 256 }
  0x3e   :  { %352 = vmatpush3.bf16.msra.mxu0 %v400_v2  ;;  %372 = vmatpush3.bf16.msra.mxu1 %v408_v6  ;;  %v322_v30 = vld [vmem:[%s619_s4] ss:$0 sm:$0xff]  ;;  %p482_p10 = scmp.ne.s32.totalorder %s301_s10, %s481_s2  ;;  %p487_p12 = scmp.lt.s32.totalorder %s481_s2, %s481_s2 }
  0x3f   :  { %353 = vmatprep.subr.bf16.mxu0 %v516_v0  ;;  %373 = vmatprep.subr.bf16.mxu1 %v516_v0 }
  0x40   :  { %p488_p13 = por %p487_p12, %p486_p11 }
  0x42   :  { %354 = vmatpush3.bf16.msra.mxu0 %v401_v3  ;;  %374 = vmatpush3.bf16.msra.mxu1 %v409_v8  ;;  %p489_p0 = pnand %p488_p13, %p482_p10 }
  0x43   :  { %355 = vmatprep.subr.bf16.mxu0 %v516_v0  ;;  %375 = vmatprep.subr.bf16.mxu1 %v516_v0 }
  0x46   :  { %356 = vmatpush3.bf16.msra.mxu0 %v402_v5  ;;  %376 = vmatpush3.bf16.msra.mxu1 %v410_v10 }
  0x47   :  { %357 = vmatprep.subr.bf16.mxu0 %v516_v0  ;;  %377 = vmatprep.subr.bf16.mxu1 %v516_v0 }
  0x4a   :  { %358 = vmatpush3.bf16.msra.mxu0 %v403_v7  ;;  %378 = vmatpush3.bf16.msra.mxu1 %v411_v12 }
  0x4b   :  { %359 = vmatprep.subr.bf16.mxu0 %v516_v0  ;;  %379 = vmatprep.subr.bf16.mxu1 %v516_v0 }
  0x4e   :  { %360 = vmatpush3.bf16.msra.mxu0 %v404_v9  ;;  %380 = vmatpush3.bf16.msra.mxu1 %v412_v16 }
  0x4f   :  { %361 = vmatprep.subr.bf16.mxu0 %v516_v0  ;;  %381 = vmatprep.subr.bf16.mxu1 %v516_v0 }
  0x52   :  { %362 = vmatpush3.bf16.msra.mxu0 %v405_v11  ;;  %382 = vmatpush3.bf16.msra.mxu1 %v413_v18 }
  0x53   :  { %363 = vmatprep.subr.bf16.mxu0 %v516_v0  ;;  %383 = vmatprep.subr.bf16.mxu1 %v516_v0 }
  0x56   :  { %364 = vmatpush3.bf16.msra.mxu0 %v406_v13  ;;  %384 = vmatpush3.bf16.msra.mxu1 %v414_v19 }
  0x59   :  { %366 = vmatmul.mubr.bf16.vlgmr.msra.gmra.mrb[0].mxu0 %v65_v17 }
 0x12c   :  { %v171_v21 = vpop.f32.mrb[0].mxu0 }
 0x12d   :  { %v172_v22 = vadd.f32 %v313_v20, %v171_v21  ;;  %v367_v23 = vpop.f32.mrb[1].mxu0 }
 0x12e   :  { %v174_v24 = vpop.f32.mrb[2].mxu0 }
 0x12f   :  { %v175_v25 = vadd.f32 %v313_v20, %v174_v24  ;;  %v368_v26 = vpop.f32.mrb[3].mxu0  ;;  %v178_v27 = vmax.f32 %v172_v22, 0.0 }
 0x131   :  { %v179_v28 = vmax.f32 %v175_v25, 0.0 }
 0x133   :  { %v180_v29 = vpack.c.bf16 %v179_v28, %v178_v27 }
 0x135   :  { %386 = vmatmul.mubr.bf16.vlgmr.msra.gmra.mrb[0].mxu1 %v180_v29 }
 0x208   :  { %v286_v31 = vpop.f32.mrb[0].mxu1 }
 0x209   :  { %v287_v32 = vadd.f32 %v322_v30, %v286_v31  ;;  %v387_v33 = vpop.f32.mrb[1].mxu1 }
 0x20a   :  { %v289_v34 = vpop.f32.mrb[2].mxu1 }
 0x20b   :  { %293 = vst [vmem:[#allocation8] sm:$0xff] %v287_v32  ;;  %v290_v35 = vadd.f32 %v322_v30, %v289_v34  ;;  %v388_v36 = vpop.f32.mrb[3].mxu1 }
 0x20d   :  { %294 = vst [vmem:[#allocation8 + $0x8] sm:$0xff] %v290_v35 }
 0x20e   :  { %492 = shalt.err (!%p489_p0)
}
 0x20f   :  { %s493_s12 = scalar_lea.hbm %s620_s5, 256 }
 0x210   :  { %p494_p1 = scmp.ne.s32.totalorder %s620_s5, %s493_s12  ;;  %p497_p2 = scmp.lt.u32.totalorder %s493_s12, %s620_s5 }
 0x212   :  { %p499_p3 = pnand %p497_p2, %p494_p1 }
 0x214   :  { %502 = shalt.err (!%p499_p3)
}
 0x215   :  { %306 = dma.vmem_to_hbm [thread:$0]  %s301_s10, 256, %s620_s5, [#allocation4], %s513_s1, %s513_s1, %s514_s17  }
 0x216   :  { %507 = dma.done.wait [#allocation4], 256  }
 0x217   :  { %508 = vsyncadd [#allocation4], 4294967040 }
 0x218   :  { %310 = vsyncpa [#allocation3], 1 }
 0x219   :  { %311 = vsyncpa [#allocation6], 1 }
 0x21a   :  { %312 = vsyncpa [#allocation4], 1 }

</bundles_post_ra>
